<compile_context>
chip_gen: v5e
topology: v5e:2x2
jax: 0.10.0
libtpu: 0.0.40
codegen_flags: <defaults>
</compile_context>

<pallas_src>
import functools
import math

import jax
import jax.numpy as jnp
from jax.experimental import pallas as pl
from jax.experimental.pallas import tpu as pltpu


# ---------------------------------------------------------------------------
# helpers
# ---------------------------------------------------------------------------

def _round_up(x, m):
    return (x + m - 1) // m * m


def _pick_tile(total_p, want):
    """Largest multiple of 128 that divides `total_p` (a multiple of 128) and is
    <= max(want, 128).  Divisor choice avoids dead (padded) tile columns."""
    want = max(128, int(want))
    m = total_p // 128
    best = 1
    for d in range(1, m + 1):
        if m % d == 0 and 128 * d <= want:
            best = d
    return 128 * best


@functools.lru_cache(maxsize=1)
def _physical_vmem_bytes():
    """Per-TensorCore VMEM capacity; conservative 64 MiB fallback (v7x)."""
    try:
        info = pltpu.get_tpu_info()
        for attr in ("vmem_capacity_bytes", "vmem_bytes"):
            val = getattr(info, attr, None)
            if val:
                return int(val)
    except Exception:
        pass
    return 64 * 1024 * 1024


def _gelu(h, approx):
    if approx:
        # tanh approximation: the transcendental goes to the EUP slot, cheaper
        # than the exact-erf polynomial on the VALU slot (v6e/v7x).
        c = math.sqrt(2.0 / math.pi)
        return 0.5 * h * (1.0 + jnp.tanh(c * (h + 0.044715 * h * h * h)))
    # exact GELU, matches nn.GELU() default: 0.5*x*(1+erf(x/sqrt(2)))
    return 0.5 * h * (1.0 + jax.lax.erf(h * (1.0 / math.sqrt(2.0))))


# ---------------------------------------------------------------------------
# kernels
# ---------------------------------------------------------------------------

def _mlp_kernel_resident(x_ref, w1_ref, b1_ref, w2_ref, b2_ref, o_ref, *,
                         approx_gelu):
    # Whole weights resident in VMEM (constant index_map -> DMA'd once).
    # x_ref: (tm, Cin_p)  w1_ref: (Cin_p, H_p)  b1_ref: (1, H_p) f32
    # w2_ref: (H_p, Cout_p)  b2_ref: (1, Cout_p) f32  o_ref: (tm, Cout_p)
    h = jnp.dot(x_ref[...], w1_ref[...], preferred_element_type=jnp.float32)
    h = _gelu(h + b1_ref[...], approx_gelu)
    # dropout -> identity (eval mode)
    y = jnp.dot(h.astype(w2_ref.dtype), w2_ref[...],
                preferred_element_type=jnp.float32)
    # final dropout -> identity (eval mode)
    o_ref[...] = (y + b2_ref[...]).astype(o_ref.dtype)


def _mlp_kernel_tiled(x_ref, w1_ref, b1_ref, w2_ref, b2_ref, o_ref, acc_ref, *,
                      approx_gelu):
    # Fallback when weights do not fit VMEM.
    # grid = (rows i, out-cols j, hidden k) with k last ("arbitrary").
    # x_ref: (tm, Cin_p)  w1_ref: (Cin_p, th)  b1_ref: (1, th) f32
    # w2_ref: (th, tn)    b2_ref: (1, tn) f32  o_ref: (tm, tn)
    # acc_ref: (tm, tn) f32 scratch
    k = pl.program_id(2)

    @pl.when(k == 0)
    def _():
        acc_ref[...] = jnp.zeros_like(acc_ref)

    h = jnp.dot(x_ref[...], w1_ref[...], preferred_element_type=jnp.float32)
    h = _gelu(h + b1_ref[...], approx_gelu)
    # dropout -> identity (eval mode)
    acc_ref[...] += jnp.dot(h.astype(w2_ref.dtype), w2_ref[...],
                            preferred_element_type=jnp.float32)

    @pl.when(k == pl.num_programs(2) - 1)
    def _():
        # final dropout -> identity (eval mode)
        o_ref[...] = (acc_ref[...] + b2_ref[...]).astype(o_ref.dtype)


# ---------------------------------------------------------------------------
# wrapper
# ---------------------------------------------------------------------------

@functools.partial(
    jax.jit, static_argnames=("tm", "th", "tn", "approx_gelu", "force_tiled"))
def mlp_forward(x, w1, b1, w2, b2, *, tm=None, th=512, tn=2048,
                approx_gelu=False, force_tiled=False):
    """Uniformer MLP forward (eval mode): gelu(x @ W1 + b1) @ W2 + b2.

    x: [B, S, Cin] -> [B, S, Cout].  bf16 weights/activations are recommended
    (native MXU path); f32 uses the slower multi-pass MXU decomposition.
    """
    B, S, Cin = x.shape
    H = w1.shape[1]
    Cout = w2.shape[1]
    M = B * S

    x_b = jnp.dtype(x.dtype).itemsize
    w_b = jnp.dtype(w2.dtype).itemsize
    o_b = x_b

    # Lane-dense channel padding targets (multiples of 128).
    Cin_p = _round_up(Cin, 128)
    H_p = _round_up(H, 128)
    Cout_p = _round_up(Cout, 128)

    # Row alignment: bf16 native sublane tile is (16, 128).
    row_align = 8 if x_b >= 4 else 16

    phys_vmem = _physical_vmem_bytes()
    vmem_budget = int(phys_vmem * 0.8)   # headroom for compiler scratch/pipeline

    if tm is None:
        # 512 on 128-MiB-VMEM chips (v5e/v6e), 256 on v7x (64 MiB).
        tm = 512 if phys_vmem >= 100 * 1024 * 1024 else 256

    tm_eff = _round_up(min(tm, _round_up(M, row_align)), row_align)

    # ---- choose path & tile sizes (all static Python) ----------------------
    def resident_bytes(tm_):
        return (2 * tm_ * Cin_p * x_b            # x block (double-buffered)
                + 2 * Cin_p * H_p * w_b          # W1 (resident; conservative x2)
                + 2 * H_p * 4                    # b1 (f32)
                + 2 * H_p * Cout_p * w_b         # W2
                + 2 * Cout_p * 4                 # b2 (f32)
                + 2 * tm_ * Cout_p * o_b         # out block
                + (2 * 4 + w_b) * tm_ * H_p)     # fc1 activation intermediates

    use_resident = not force_tiled
    if use_resident:
        while resident_bytes(tm_eff) > vmem_budget and tm_eff > 128:
            tm_eff = max(128, _round_up(tm_eff // 2, row_align))
        use_resident = resident_bytes(tm_eff) <= vmem_budget

    th_eff = tn_eff = None
    if not use_resident:
        tm_eff = _round_up(min(tm, _round_up(M, row_align)), row_align)
        th_eff = _pick_tile(H_p, th)
        tn_eff = _pick_tile(Cout_p, tn)

        def tiled_bytes(tm_, th_, tn_):
            return (2 * tm_ * Cin_p * x_b
                    + 2 * Cin_p * th_ * w_b
                    + 2 * th_ * 4
                    + 2 * th_ * tn_ * w_b
                    + 2 * tn_ * 4
                    + 2 * tm_ * tn_ * o_b
                    + tm_ * tn_ * 4              # f32 accumulator scratch
                    + (2 * 4 + w_b) * tm_ * th_)

        while tiled_bytes(tm_eff, th_eff, tn_eff) > vmem_budget:
            if tm_eff > 128:
                tm_eff = max(128, _round_up(tm_eff // 2, row_align))
            elif tn_eff > 128:
                tn_eff = _pick_tile(Cout_p, tn_eff // 2)
            elif th_eff > 128:
                th_eff = _pick_tile(H_p, th_eff // 2)
            else:
                break  # best effort; vmem_limit_bytes is already raised

    # Ensure >= 2 row tiles when possible so both v7x TensorCores get work.
    M_p = _round_up(M, tm_eff)
    if M_p // tm_eff < 2 and M_p >= 2 * row_align:
        tm_eff = _round_up(M_p // 2, row_align)
        M_p = _round_up(M, tm_eff)

    # ---- padding (skipped entirely when dims are already aligned) ----------
    # Zero padding keeps the math exact: padded hidden units see 0 pre-bias
    # contributions, padded weight rows/cols are 0, and padded rows are sliced
    # off.  For non-128-multiple channel dims, hoist weight padding to init.
    x2 = x.reshape(M, Cin)
    if (M_p, Cin_p) != (M, Cin):
        x2 = jnp.pad(x2, ((0, M_p - M), (0, Cin_p - Cin)))
    w1_p = w1 if (Cin_p, H_p) == (Cin, H) else jnp.pad(
        w1, ((0, Cin_p - Cin), (0, H_p - H)))
    w2_p = w2 if (H_p, Cout_p) == (H, Cout) else jnp.pad(
        w2, ((0, H_p - H), (0, Cout_p - Cout)))
    b1_p = (b1 if H_p == H else jnp.pad(b1, (0, H_p - H)))
    b1_p = b1_p.reshape(1, H_p).astype(jnp.float32)
    b2_p = (b2 if Cout_p == Cout else jnp.pad(b2, (0, Cout_p - Cout)))
    b2_p = b2_p.reshape(1, Cout_p).astype(jnp.float32)

    # ---- pallas_call --------------------------------------------------------
    if use_resident:
        grid = (M_p // tm_eff,)
        out = pl.pallas_call(
            functools.partial(_mlp_kernel_resident, approx_gelu=approx_gelu),
            out_shape=jax.ShapeDtypeStruct((M_p, Cout_p), x.dtype),
            grid_spec=pltpu.PrefetchScalarGridSpec(
                num_scalar_prefetch=0,
                grid=grid,
                in_specs=[
                    pl.BlockSpec((tm_eff, Cin_p), lambda i: (i, 0)),   # x rows
                    pl.BlockSpec((Cin_p, H_p), lambda i: (0, 0)),      # W1 resident
                    pl.BlockSpec((1, H_p), lambda i: (0, 0)),          # b1 (f32)
                    pl.BlockSpec((H_p, Cout_p), lambda i: (0, 0)),     # W2 resident
                    pl.BlockSpec((1, Cout_p), lambda i: (0, 0)),       # b2 (f32)
                ],
                out_specs=pl.BlockSpec((tm_eff, Cout_p), lambda i: (i, 0)),
            ),
            compiler_params=pltpu.CompilerParams(
                dimension_semantics=("parallel",),
                vmem_limit_bytes=vmem_budget,
            ),
        )(x2, w1_p, b1_p, w2_p, b2_p)
    else:
        grid = (M_p // tm_eff, Cout_p // tn_eff, H_p // th_eff)
        out = pl.pallas_call(
            functools.partial(_mlp_kernel_tiled, approx_gelu=approx_gelu),
            out_shape=jax.ShapeDtypeStruct((M_p, Cout_p), x.dtype),
            grid_spec=pltpu.PrefetchScalarGridSpec(
                num_scalar_prefetch=0,
                grid=grid,
                in_specs=[
                    pl.BlockSpec((tm_eff, Cin_p), lambda i, j, k: (i, 0)),  # x
                    pl.BlockSpec((Cin_p, th_eff), lambda i, j, k: (0, k)),  # W1
                    pl.BlockSpec((1, th_eff), lambda i, j, k: (0, k)),      # b1
                    pl.BlockSpec((th_eff, tn_eff), lambda i, j, k: (k, j)),  # W2
                    pl.BlockSpec((1, tn_eff), lambda i, j, k: (0, j)),      # b2
                ],
                out_specs=pl.BlockSpec((tm_eff, tn_eff),
                                       lambda i, j, k: (i, j)),
                scratch_shapes=[pltpu.VMEM((tm_eff, tn_eff), jnp.float32)],
            ),
            compiler_params=pltpu.CompilerParams(
                dimension_semantics=("parallel", "parallel", "arbitrary"),
                vmem_limit_bytes=vmem_budget,
            ),
        )(x2, w1_p, b1_p, w2_p, b2_p)

    return out[:M, :Cout].reshape(B, S, Cout)


# ---------------------------------------------------------------------------
# demo / self-test
# ---------------------------------------------------------------------------

def init_params(key, in_channels, hidden, out_channels, dtype=jnp.float32):
    """Deterministic init mimicking nn.Linear's uniform(-1/sqrt(fan_in), ...)."""
    k1, k2, k3, k4 = jax.random.split(key, 4)
    bound1 = 1.0 / math.sqrt(in_channels)
    bound2 = 1.0 / math.sqrt(hidden)
    w1 = jax.random.uniform(k1, (in_channels, hidden), dtype, -bound1, bound1)
    b1 = jax.random.uniform(k2, (hidden,), dtype, -bound1, bound1)
    w2 = jax.random.uniform(k3, (hidden, out_channels), dtype, -bound2, bound2)
    b2 = jax.random.uniform(k4, (out_channels,), dtype, -bound2, bound2)
    return w1, b1, w2, b2


def _reference(x, w1, b1, w2, b2):
    h = jax.nn.gelu(x @ w1 + b1, approximate=False)
    return h @ w2 + b2   # eval-mode dropout == identity


if __name__ == "__main__":
    key = jax.random.PRNGKey(0)
    kx, kp, kx2, kp2 = jax.random.split(key, 4)

    # --- small case, exercises the weight-resident fast path ----------------
    B, S, Cin = 2, 8, 32
    hidden, Cout = 64, 32
    x = jax.random.normal(kx, (B, S, Cin), dtype=jnp.float32)
    w1, b1, w2, b2 = init_params(kp, Cin, hidden, Cout)

    out = jax.block_until_ready(mlp_forward(x, w1, b1, w2, b2))
    ref = _reference(x, w1, b1, w2, b2)
    assert out.shape == (B, S, Cout)
    assert jnp.allclose(out, ref, atol=2e-3, rtol=2e-3), "resident path mismatch"

    # --- forced tiled fallback (multi-step hidden reduction + Cout tiling) --
    B2, S2, Cin2 = 2, 64, 128
    hidden2, Cout2 = 320, 256
    x2 = jax.random.normal(kx2, (B2, S2, Cin2), dtype=jnp.float32)
    p2 = init_params(kp2, Cin2, hidden2, Cout2)
    out2 = jax.block_until_ready(
        mlp_forward(x2, *p2, tm=128, th=128, tn=128, force_tiled=True))
    ref2 = _reference(x2, *p2)
    assert out2.shape == (B2, S2, Cout2)
    assert jnp.allclose(out2, ref2, atol=1e-2, rtol=1e-2), "tiled path mismatch"

    # --- bf16 smoke test (native MXU feeds, f32 accumulation) ---------------
    xb = x.astype(jnp.bfloat16)
    pb = tuple(a.astype(jnp.bfloat16) for a in (w1, b1, w2, b2))
    out_bf16 = jax.block_until_ready(mlp_forward(xb, *pb))
    assert out_bf16.shape == (B, S, Cout)
    assert bool(jnp.all(jnp.isfinite(out_bf16.astype(jnp.float32))))

    print("KERNEL_OK")
</pallas_src>

<mosaic_0001>
module attributes {stable_mosaic.version = 11 : i64} {
  func.func @_mlp_kernel_resident(%arg0: i32, %arg1: memref<8x128xf32, #tpu.memory_space<vmem>>, %arg2: memref<128x128xf32, #tpu.memory_space<vmem>>, %arg3: memref<1x128xf32, #tpu.memory_space<vmem>>, %arg4: memref<128x128xf32, #tpu.memory_space<vmem>>, %arg5: memref<1x128xf32, #tpu.memory_space<vmem>>, %arg6: memref<8x128xf32, #tpu.memory_space<vmem>>) attributes {dimension_semantics = [#tpu.dimension_semantics<parallel>], iteration_bounds = array<i64: 2>, scalar_prefetch = 0 : i64, scratch_operands = 0 : i64, tpu.core_type = #tpu.core_type<tc>, window_params = [{transform_indices = @transform_0, window_bounds = array<i64: 8, 128>}, {pipeline_mode = #tpu.pipeline_mode<synchronous>, transform_indices = @transform_1, window_bounds = array<i64: 128, 128>}, {pipeline_mode = #tpu.pipeline_mode<synchronous>, transform_indices = @transform_2, window_bounds = array<i64: 1, 128>}, {pipeline_mode = #tpu.pipeline_mode<synchronous>, transform_indices = @transform_3, window_bounds = array<i64: 128, 128>}, {pipeline_mode = #tpu.pipeline_mode<synchronous>, transform_indices = @transform_4, window_bounds = array<i64: 1, 128>}, {transform_indices = @transform_5, window_bounds = array<i64: 8, 128>}]} {
    %c0 = arith.constant 0 : index
    %c0_0 = arith.constant 0 : index
    %0 = vector.load %arg1[%c0, %c0_0] : memref<8x128xf32, #tpu.memory_space<vmem>>, vector<8x128xf32>
    %c0_1 = arith.constant 0 : index
    %c0_2 = arith.constant 0 : index
    %1 = vector.load %arg2[%c0_1, %c0_2] : memref<128x128xf32, #tpu.memory_space<vmem>>, vector<128x128xf32>
    %cst = arith.constant dense<0.000000e+00> : vector<8x128xf32>
    %2 = tpu.matmul %0, %1, %cst {dimension_numbers = #tpu.dot_dimension_numbers<[1], [0], [0], [1], [0, 0, 1, 1], [], []>} : vector<8x128xf32>, vector<128x128xf32>, vector<8x128xf32> -> vector<8x128xf32>
    %c0_3 = arith.constant 0 : index
    %c0_4 = arith.constant 0 : index
    %3 = vector.load %arg3[%c0_3, %c0_4] : memref<1x128xf32, #tpu.memory_space<vmem>>, vector<1x128xf32>
    %4 = vector.broadcast %3 : vector<1x128xf32> to vector<8x128xf32>
    %5 = arith.addf %2, %4 : vector<8x128xf32>
    %cst_5 = arith.constant 5.000000e-01 : f32
    %6 = vector.broadcast %cst_5 : f32 to vector<8x128xf32>
    %7 = arith.mulf %6, %5 : vector<8x128xf32>
    %cst_6 = arith.constant 0.707106769 : f32
    %8 = vector.broadcast %cst_6 : f32 to vector<8x128xf32>
    %9 = arith.mulf %5, %8 : vector<8x128xf32>
    %10 = math.erf %9 : vector<8x128xf32>
    %cst_7 = arith.constant 1.000000e+00 : f32
    %11 = vector.broadcast %cst_7 : f32 to vector<8x128xf32>
    %12 = arith.addf %11, %10 : vector<8x128xf32>
    %13 = arith.mulf %7, %12 : vector<8x128xf32>
    %c0_8 = arith.constant 0 : index
    %c0_9 = arith.constant 0 : index
    %14 = vector.load %arg4[%c0_8, %c0_9] : memref<128x128xf32, #tpu.memory_space<vmem>>, vector<128x128xf32>
    %cst_10 = arith.constant dense<0.000000e+00> : vector<8x128xf32>
    %15 = tpu.matmul %13, %14, %cst_10 {dimension_numbers = #tpu.dot_dimension_numbers<[1], [0], [0], [1], [0, 0, 1, 1], [], []>} : vector<8x128xf32>, vector<128x128xf32>, vector<8x128xf32> -> vector<8x128xf32>
    %c0_11 = arith.constant 0 : index
    %c0_12 = arith.constant 0 : index
    %16 = vector.load %arg5[%c0_11, %c0_12] : memref<1x128xf32, #tpu.memory_space<vmem>>, vector<1x128xf32>
    %17 = vector.broadcast %16 : vector<1x128xf32> to vector<8x128xf32>
    %18 = arith.addf %15, %17 : vector<8x128xf32>
    %c0_13 = arith.constant 0 : index
    %c0_14 = arith.constant 0 : index
    %19 = vector.load %arg6[%c0_13, %c0_14] : memref<8x128xf32, #tpu.memory_space<vmem>>, vector<8x128xf32>
    tpu.vector_store %arg6[%c0_13, %c0_14], %18 {strides = array<i32>} : memref<8x128xf32, #tpu.memory_space<vmem>>, vector<8x128xf32>,
    return
  }
  func.func @transform_0(%arg0: i32) -> (i32, i32) {
    %c0_i32 = arith.constant 0 : i32
    %c0_i32_0 = arith.constant 0 : i32
    return %arg0, %c0_i32 : i32, i32
  }
  func.func @transform_1(%arg0: i32) -> (i32, i32) {
    %c0_i32 = arith.constant 0 : i32
    %c0_i32_0 = arith.constant 0 : i32
    %c0_i32_1 = arith.constant 0 : i32
    return %c0_i32, %c0_i32_0 : i32, i32
  }
  func.func @transform_2(%arg0: i32) -> (i32, i32) {
    %c0_i32 = arith.constant 0 : i32
    %c0_i32_0 = arith.constant 0 : i32
    %c0_i32_1 = arith.constant 0 : i32
    return %c0_i32, %c0_i32_0 : i32, i32
  }
  func.func @transform_3(%arg0: i32) -> (i32, i32) {
    %c0_i32 = arith.constant 0 : i32
    %c0_i32_0 = arith.constant 0 : i32
    %c0_i32_1 = arith.constant 0 : i32
    return %c0_i32, %c0_i32_0 : i32, i32
  }
  func.func @transform_4(%arg0: i32) -> (i32, i32) {
    %c0_i32 = arith.constant 0 : i32
    %c0_i32_0 = arith.constant 0 : i32
    %c0_i32_1 = arith.constant 0 : i32
    return %c0_i32, %c0_i32_0 : i32, i32
  }
  func.func @transform_5(%arg0: i32) -> (i32, i32) {
    %c0_i32 = arith.constant 0 : i32
    %c0_i32_0 = arith.constant 0 : i32
    return %arg0, %c0_i32 : i32, i32
  }
}

</mosaic_0001>

<bundles_post_ra>
// kernel: mlp_forward.1
= control target key start
LH: loop header
LB: loop body
LE: loop exit
PB: predicated region body
PF: predicated region fallthrough
CT: control target
= control target key end

     0   :  { %s459_s18 = smov 0   ;;  %s585_s0 = inlined_call_operand.vmem [shape: f32[16,128], index: 0, kind: input, shape index: {}]   ;;  %s586_s1 = inlined_call_operand.vmem [shape: f32[128,128], index: 1, kind: input, shape index: {}]   ;;  %s587_s2 = inlined_call_operand.vmem [shape: f32[1,128], index: 2, kind: input, shape index: {}]   ;;  %s588_s3 = inlined_call_operand.vmem [shape: f32[128,128], index: 3, kind: input, shape index: {}]   ;;  %s589_s4 = inlined_call_operand.vmem [shape: f32[1,128], index: 4, kind: input, shape index: {}]   ;;  %s590_s5 = inlined_call_operand.vmem [shape: f32[16,128], index: 5, kind: output, shape index: {}]  }
   0x1 LB: > { %s399_s19 = sadd.s32 4294967295, %s427_s18   ;;  %p403_p0 = scmp.ge.s32.totalorder %s427_s18, 1  ;;  %s427_s18 = sphi %s459_s18, %s15_s18  }
   0x2   : > { %p186_p1 = scmp.lt.s32.totalorder %s427_s18, 3 }
   0x4   : > { %p187_p2 = pnand %p403_p0, %p186_p1 }
   0x5   : > { %p212_p3 = scmp.lt.s32.totalorder (!%p187_p2), %s399_s19, 1 }
   0x6   : > { %190 = sbr.rel (%p187_p2) target bundleno = 351 (0x15f), region = 40 }
   0xb   : > { %v236_v0 = vld [vmem:[%s586_s1 + $0x78] sm:$0xff]  ;;  %v235_v1 = vld [vmem:[%s586_s1 + $0x70] sm:$0xff]  ;;  %v234_v2 = vld [vmem:[%s586_s1 + $0x68] sm:$0xff]  ;;  %s592_s19 = smov (!%p212_p3, %s399_s19), 1 }
   0xc   : > { %241 = vmatpush.msra.mxu0 %v236_v0  ;;  %v233_v3 = vld [vmem:[%s586_s1 + $0x60] sm:$0xff]  ;;  %v232_v4 = vld [vmem:[%s586_s1 + $0x58] sm:$0xff]  ;;  %v231_v5 = vld [vmem:[%s586_s1 + $0x50] sm:$0xff]  ;;  %s404_s23 = sshll.u32 %s592_s19, 3 }
   0xd   : > { %v230_v6 = vld [vmem:[%s586_s1 + $0x48] sm:$0xff]  ;;  %v229_v7 = vld [vmem:[%s586_s1 + $0x40] sm:$0xff]  ;;  %v228_v8 = vld [vmem:[%s586_s1 + $0x38] sm:$0xff]  ;;  %s215_s30 = scalar_lea.vmem %s585_s0, %s404_s23  ;;  %s219_s27 = scalar_lea.vmem %s590_s5, %s404_s23 }
   0xe   : > { %242 = vmatpush.msra.mxu0 %v235_v1  ;;  %v227_v9 = vld [vmem:[%s586_s1 + $0x30] sm:$0xff]  ;;  %v226_v10 = vld [vmem:[%s586_s1 + $0x28] sm:$0xff]  ;;  %v225_v11 = vld [vmem:[%s586_s1 + $0x20] sm:$0xff] }
   0xf   : > { %v224_v12 = vld [vmem:[%s586_s1 + $0x18] sm:$0xff]  ;;  %v223_v13 = vld [vmem:[%s586_s1 + $0x10] sm:$0xff]  ;;  %v222_v14 = vld [vmem:[%s586_s1 + $0x8] sm:$0xff] }
  0x10   : > { %243 = vmatpush.msra.mxu0 %v234_v2  ;;  %v221_v15 = vld [vmem:[%s586_s1] sm:$0xff]  ;;  %v320_v17 = vld [vmem:[%s588_s3 + $0x78] sm:$0xff]  ;;  %v319_v18 = vld [vmem:[%s588_s3 + $0x70] sm:$0xff] }
  0x11   : > { %v220_v16 = vld [vmem:[%s215_s30] sm:$0xff]  ;;  %325 = vmatpush.msra.mxu1 %v320_v17  ;;  %v318_v19 = vld [vmem:[%s588_s3 + $0x68] sm:$0xff]  ;;  %v316_v22 = vld [vmem:[%s588_s3 + $0x58] sm:$0xff] }
  0x12   : > { %244 = vmatpush.msra.mxu0 %v233_v3  ;;  %v317_v20 = vld [vmem:[%s588_s3 + $0x60] sm:$0xff]  ;;  %v315_v23 = vld [vmem:[%s588_s3 + $0x50] sm:$0xff]  ;;  %v314_v25 = vld [vmem:[%s588_s3 + $0x48] sm:$0xff] }
  0x13   : > { %326 = vmatpush.msra.mxu1 %v319_v18  ;;  %v417_v21 = vld [vmem:[%s587_s2] ss:$0 sm:$0xff]  ;;  %v312_v29 = vld [vmem:[%s588_s3 + $0x38] sm:$0xff]  ;;  %v311_v31 = vld [vmem:[%s588_s3 + $0x30] sm:$0xff] }
  0x14   : > { %245 = vmatpush.msra.mxu0 %v232_v4  ;;  %v313_v27 = vld [vmem:[%s588_s3 + $0x40] sm:$0xff]  ;;  %v310_v33 = vld [vmem:[%s588_s3 + $0x28] sm:$0xff]  ;;  %v308_v39 = vld [vmem:[%s588_s3 + $0x18] sm:$0xff] }
  0x15   : > { %327 = vmatpush.msra.mxu1 %v318_v19  ;;  %v309_v36 = vld [vmem:[%s588_s3 + $0x20] sm:$0xff]  ;;  %v307_v42 = vld [vmem:[%s588_s3 + $0x10] sm:$0xff]  ;;  %v306_v45 = vld [vmem:[%s588_s3 + $0x8] sm:$0xff] }
  0x16   : > { %246 = vmatpush.msra.mxu0 %v231_v5  ;;  %v305_v47 = vld [vmem:[%s588_s3] sm:$0xff] }
  0x17   : > { %328 = vmatpush.msra.mxu1 %v317_v20 }
  0x18   : > { %247 = vmatpush.msra.mxu0 %v230_v6 }
  0x19   : > { %329 = vmatpush.msra.mxu1 %v316_v22 }
  0x1a   : > { %248 = vmatpush.msra.mxu0 %v229_v7 }
  0x1b   : > { %330 = vmatpush.msra.mxu1 %v315_v23 }
  0x1c   : > { %249 = vmatpush.msra.mxu0 %v228_v8 }
  0x1d   : > { %331 = vmatpush.msra.mxu1 %v314_v25 }
  0x1e   : > { %250 = vmatpush.msra.mxu0 %v227_v9 }
  0x1f   : > { %332 = vmatpush.msra.mxu1 %v313_v27 }
  0x20   : > { %251 = vmatpush.msra.mxu0 %v226_v10 }
  0x21   : > { %333 = vmatpush.msra.mxu1 %v312_v29 }
  0x22   : > { %252 = vmatpush.msra.mxu0 %v225_v11  ;;  %v418_v11 = vld [vmem:[%s589_s4] ss:$0 sm:$0xff] }
  0x23   : > { %334 = vmatpush.msra.mxu1 %v311_v31 }
  0x24   : > { %253 = vmatpush.msra.mxu0 %v224_v12 }
  0x25   : > { %335 = vmatpush.msra.mxu1 %v310_v33 }
  0x26   : > { %254 = vmatpush.msra.mxu0 %v223_v13 }
  0x27   : > { %336 = vmatpush.msra.mxu1 %v309_v36 }
  0x28   : > { %255 = vmatpush.msra.mxu0 %v222_v14 }
  0x29   : > { %337 = vmatpush.msra.mxu1 %v308_v39 }
  0x2a   : > { %256 = vmatpush.msra.mxu0 %v221_v15 }
  0x2b   : > { %257 = vmatmul.f32.vlgmr.msra.gmra.mxu0 %v220_v16  ;;  %338 = vmatpush.msra.mxu1 %v307_v42 }
  0x2d   : > { %339 = vmatpush.msra.mxu1 %v306_v45 }
  0x2f   : > { %340 = vmatpush.msra.mxu1 %v305_v47 }
  0xa8   : > { %v258_v24 = vpop.f32.mrf.mxu0 }
  0xa9   : > { %v259_v26 = vadd.f32 %v417_v21, %v258_v24 }
  0xab   : > { %v262_v28 = vmul.f32 0.70710677, %v259_v26  ;;  %v261_v8 = vmul.f32 0.5, %v259_v26 }
  0xad   : > { %v263_v30 = vmul.f32 %v262_v28, %v262_v28 }
  0xaf   : > { %v264_v32 = vmin.f32 %v263_v30, 16.0 }
  0xb1   : > { %v265_v34 = vmul.f32 2.1237322e-06, %v264_v32  ;;  %v276_v35 = vmul.f32 3.8918573e-05, %v264_v32 }
  0xb3   : > { %v266_v37 = vadd.f32 0.00028619796, %v265_v34  ;;  %v277_v38 = vadd.f32 0.001143296, %v276_v35 }
  0xb5   : > { %v267_v40 = vmul.f32 %v266_v37, %v264_v32  ;;  %v278_v41 = vmul.f32 %v277_v38, %v264_v32 }
  0xb7   : > { %v279_v43 = vadd.f32 0.014752088, %v278_v41  ;;  %v268_v44 = vadd.f32 0.0036580483, %v267_v40 }
  0xb9   : > { %v280_v46 = vmul.f32 %v279_v43, %v264_v32  ;;  %v269_v49 = vmul.f32 %v268_v44, %v264_v32 }
  0xbb   : > { %v281_v48 = vadd.f32 0.112945676, %v280_v46  ;;  %v270_v52 = vadd.f32 0.05243302, %v269_v49 }
  0xbd   : > { %v282_v50 = vmul.f32 %v281_v48, %v264_v32  ;;  %v271_v55 = vmul.f32 %v270_v52, %v264_v32 }
  0xbf   : > { %v283_v51 = vadd.f32 0.4994258, %v282_v50  ;;  %v272_v56 = vadd.f32 0.18741608, %v271_v55 }
  0xc1   : > { %v284_v53 = vmul.f32 %v283_v51, %v264_v32  ;;  %v273_v58 = vmul.f32 %v272_v56, %v264_v32 }
  0xc3   : > { %v285_v54 = vadd.f32 1.0, %v284_v53  ;;  %v274_v62 = vadd.f32 1.1283791, %v273_v58 }
  0xc5   : > { %419 = vrcp.f32 %v285_v54  ;;  %v297_v61 = vand.u32 2147483648, %v285_v54  ;;  %v295_v0 = vand.u32 2147483647, %v285_v54  ;;  %vm291_vm1 = vweird.f32 %v285_v54 }
  0xc6   : > { %v275_v3 = vmul.f32 %v274_v62, %v262_v28 }
  0xc7   : > { %v298_v2 = vor.u32 1.1754944e-38, %v297_v61  ;;  %vm296_vm3 = vcmp.eq.f32.partialorder %v295_v0, 8.507059e+37 }
  0xcb   : > { %v420_v57 = vpop.eup %419 }
  0xcc   : > { %v287_v59 = vmul.f32 %v420_v57, %v285_v54  ;;  %vm292_vm0 = vweird.f32 %v420_v57 }
  0xcd   : > { %vm293_vm2 = vmor %vm291_vm1, %vm292_vm0 }
  0xce   : > { %v288_v60 = vsub.f32 1.0, %v287_v59 }
  0xd0   : > { %v289_v63 = vmul.f32 %v420_v57, %v288_v60 }
  0xd2   : > { %v290_v1 = vadd.f32 %v420_v57, %v289_v63 }
  0xd4   : > { %v294_v4 = vsel %vm293_vm2, %v420_v57, %v290_v1 }
  0xd5   : > { %v299_v5 = vsel %vm296_vm3, %v298_v2, %v294_v4 }
  0xd6   : > { %v300_v6 = vmul.f32 %v299_v5, %v275_v3 }
  0xd8   : > { %v406_v7 = vclamps-f32 %v300_v6, 1.0 }
  0xda   : > { %v303_v9 = vadd.f32 1.0, %v406_v7 }
  0xdc   : > { %v304_v10 = vmul.f32 %v303_v9, %v261_v8 }
  0xde   : > { %341 = vmatmul.f32.vlgmr.msra.gmra.mxu1 %v304_v10 }
 0x15b   : > { %v342_v12 = vpop.f32.mrf.mxu1 }
 0x15c   : > { %v343_v13 = vadd.f32 %v418_v11, %v342_v12 }
 0x15e   : > { %345 = vst [vmem:[%s219_s27] sm:$0xff] %v343_v13 }
 0x15f PF: > { %s15_s18 = sadd.s32 1, %s427_s18  }
 0x160   : > { %p12_p4 = scmp.ge.s32.totalorder %s15_s18, 4  }
 0x162   :  { %14 = sbr.rel (!%p12_p4) target bundleno = 1 (0x1), region = 70 }

</bundles_post_ra>
